<compile_context>
chip_gen: v6e
topology: v6e:2x2x1
jax: 0.10.0
libtpu: 0.0.40
codegen_flags: <defaults>
</compile_context>

<pallas_src>
import functools

import jax
import jax.numpy as jnp
from jax.experimental import pallas as pl
from jax.experimental.pallas import tpu as pltpu

_EPS = 1e-5


def _round_up(x, m):
    return ((x + m - 1) // m) * m


# ---------------------------------------------------------------------------
# Kernels
# ---------------------------------------------------------------------------
def _pass1_kernel(x_ref, w1_ref, xk_ref, stats_ref, *, b_total):
    """Stream raw f32 x: emit the zero-padded bf16 copy `xk` plus the per-tile
    partial (sum, sum-of-squares) of h1 = X @ W1."""
    bt, s, d = x_ref.shape
    _, sp, dp = xk_ref.shape

    xb = x_ref[...]                                          # (bt, s, d) f32
    if b_total % bt != 0:
        # last grid step reads past the end of x -> zero those rows so they
        # neither leak into `xk` nor into the bn1 batch statistics.
        row = pl.program_id(0) * bt + jax.lax.broadcasted_iota(
            jnp.int32, (bt, 1, 1), 0)
        xb = jnp.where(row < b_total, xb, 0.0)
    xb16 = xb.astype(jnp.bfloat16)

    if (sp == s) and (dp == d):
        xk_ref[...] = xb16
        xp = xb16
    else:
        xk_ref[...] = jnp.zeros(xk_ref.shape, jnp.bfloat16)
        xk_ref[:, :s, :d] = xb16
        xp = xk_ref[...]                                     # padded, zeros outside

    h1 = jnp.dot(xp.reshape(bt * sp, dp), w1_ref[...],
                 preferred_element_type=jnp.float32)
    # padded rows have h1 == 0 -> they contribute nothing to the sums.
    stats_ref[0:1, 0:1, :] = jnp.sum(h1, axis=0, keepdims=True)[None]
    stats_ref[0:1, 1:2, :] = jnp.sum(h1 * h1, axis=0, keepdims=True)[None]


def _pass2_kernel(xk_ref, w1_ref, w2_ref, bn1_ref, stats_ref, *,
                  b_total, s_valid):
    """Per-tile partial (sum, sumsq) of h2 = relu(bn1(X@W1)) @ W2, with padded
    rows/positions masked out of the statistics."""
    bt, sp, dp = xk_ref.shape
    cp = w1_ref.shape[1]

    x = xk_ref[...].reshape(bt * sp, dp)
    h1 = jnp.dot(x, w1_ref[...], preferred_element_type=jnp.float32)
    bn1 = bn1_ref[...]                                       # (2, cp): scale, shift
    y1 = jnp.maximum(h1 * bn1[0:1, :] + bn1[1:2, :], 0.0)

    need_s_mask = (s_valid != sp)
    need_b_mask = (b_total % bt != 0)
    if need_s_mask or need_b_mask:
        # padded rows have h1 == 0 but y1 == relu(shift1) which is generally
        # nonzero: zero them so h2's batch statistics stay unbiased.
        y1_3d = y1.reshape(bt, sp, cp)
        valid = None
        if need_s_mask:
            sidx = jax.lax.broadcasted_iota(jnp.int32, (1, sp, 1), 1)
            valid = sidx < s_valid
        if need_b_mask:
            ridx = pl.program_id(0) * bt + jax.lax.broadcasted_iota(
                jnp.int32, (bt, 1, 1), 0)
            bmask = ridx < b_total
            valid = bmask if valid is None else jnp.logical_and(valid, bmask)
        y1_3d = jnp.where(valid, y1_3d, 0.0)
        y1 = y1_3d.reshape(bt * sp, cp)

    h2 = jnp.dot(y1.astype(w2_ref.dtype), w2_ref[...],
                 preferred_element_type=jnp.float32)
    stats_ref[0:1, 0:1, :] = jnp.sum(h2, axis=0, keepdims=True)[None]
    stats_ref[0:1, 1:2, :] = jnp.sum(h2 * h2, axis=0, keepdims=True)[None]


def _pass3_kernel(xk_ref, w1_ref, w2_ref, bn_ref, out_ref, *, s_valid):
    """y2 = relu(bn2(relu(bn1(X@W1)) @ W2)); out = max over s for one tile."""
    bt, sp, dp = xk_ref.shape
    cp = w1_ref.shape[1]

    x = xk_ref[...].reshape(bt * sp, dp)
    h1 = jnp.dot(x, w1_ref[...], preferred_element_type=jnp.float32)
    bn = bn_ref[...]                                         # (4, cp)
    y1 = jnp.maximum(h1 * bn[0:1, :] + bn[1:2, :], 0.0)
    h2 = jnp.dot(y1.astype(w2_ref.dtype), w2_ref[...],
                 preferred_element_type=jnp.float32)
    y2 = jnp.maximum(h2 * bn[2:3, :] + bn[3:4, :], 0.0)
    y2 = y2.reshape(bt, sp, cp)
    if s_valid != sp:
        # zero-padded s positions must not win the max
        sidx = jax.lax.broadcasted_iota(jnp.int32, (1, sp, 1), 1)
        y2 = jnp.where(sidx < s_valid, y2, -jnp.inf)
    out_ref[...] = jnp.max(y2, axis=1).astype(out_ref.dtype)
    # (padded batch rows produce garbage here; the wrapper slices them away)


# ---------------------------------------------------------------------------
# Tiling / VMEM budgeting
# ---------------------------------------------------------------------------
def _vmem_budget():
    """(vmem_limit_bytes, per-step working-set budget) for this generation."""
    try:
        phys = pltpu.get_tpu_info().vmem_capacity_bytes
    except Exception:
        phys = 64 * 1024 * 1024          # conservative fallback: v7x (64 MiB/TC)
    limit = min(phys * 3 // 4, 96 * 1024 * 1024)   # v7x: 48 MiB, v5e/v6e: 96 MiB
    budget = limit * 3 // 5                        # leave room for Mosaic scratch
    return int(limit), int(budget)


def _choose_bt(B, s, sp, d, dp, cp, budget_bytes):
    """Largest batch-tile (multiple of 8) whose per-step VMEM estimate fits the
    budget, while keeping >= 2 grid steps when B allows (v7x has 2 TCs)."""
    per_bt = (2 * s * d * 4        # raw f32 x, double-buffered (pass 1)
              + 2 * sp * dp * 2    # padded bf16 x, double-buffered
              + sp * cp * 18       # f32 h1/y1/h2/y2 + bf16 y1 copy
              + 2 * cp * 4)        # pass-3 output tile
    fixed = 2 * (dp * cp + cp * cp) * 2            # bf16 weights, 2 buffers each
    bt = max(8, ((budget_bytes - fixed) // per_bt) // 8 * 8)
    bt = min(bt, _round_up(B, 8))
    if B > 8:
        bt = min(bt, _round_up(pl.cdiv(B, 2), 8))  # ensure >= 2 parallel steps
    return max(bt, 8)
    # TODO(synk): when the minimum tile (bt=8) still exceeds the budget for
    # very long s, split the s axis over an "arbitrary" grid dimension.


# ---------------------------------------------------------------------------
# Wrappers
# ---------------------------------------------------------------------------
def prepare_local_op_params(w1, w2, gamma1, beta1, gamma2, beta2):
    """One-time weight prep (hoisted out of the per-call path): transpose conv
    weights to (in, out), zero-pad channels, cast matmul weights to bf16."""
    C, d = w1.shape
    cp = _round_up(C, 128)          # lane-dense intermediates & output
    dp = _round_up(d, 8)            # keep the dominant x stream small

    w1p = jnp.zeros((dp, cp), jnp.bfloat16).at[:d, :C].set(
        jnp.transpose(w1).astype(jnp.bfloat16))
    w2p = jnp.zeros((cp, cp), jnp.bfloat16).at[:C, :C].set(
        jnp.transpose(w2).astype(jnp.bfloat16))

    def _pad_c(v):
        return jnp.zeros((cp,), jnp.float32).at[:C].set(v.astype(jnp.float32))

    return {
        "w1": w1p, "w2": w2p,
        "gamma1": _pad_c(gamma1), "beta1": _pad_c(beta1),
        "gamma2": _pad_c(gamma2), "beta2": _pad_c(beta2),
        "C": C, "d": d, "Cp": cp, "Dp": dp,
    }


def _fold_bn(partial_stats, gamma, beta, n_elems):
    """Reduce per-tile partial sums -> training-mode BN scale/shift (f32)."""
    s = jnp.sum(partial_stats, axis=0)                       # (2, cp)
    mean = s[0] / n_elems
    var = jnp.maximum(s[1] / n_elems - mean * mean, 0.0)     # guard cancellation
    scale = gamma * jax.lax.rsqrt(var + _EPS)
    shift = beta - mean * scale
    return scale, shift


def local_op(x, params):
    """x: (b, n, s, d) float32 -> (b, C, n) float32 (PyTorch Local_op forward)."""
    b, n, s, d = x.shape
    assert d == params["d"]
    C, cp, dp = params["C"], params["Cp"], params["Dp"]
    B = b * n

    sp = _round_up(s, 16)                    # bf16 sublane packing: (bt,sp) merge free
    vmem_limit, vmem_budget = _vmem_budget()
    bt = _choose_bt(B, s, sp, d, dp, cp, vmem_budget)
    nt = pl.cdiv(B, bt)
    bp = nt * bt

    x3 = x.reshape(B, s, d)                  # metadata-only reshape of raw f32 input
    n_elems = float(B * s)                   # true BN population per channel

    cparams = pltpu.CompilerParams(
        dimension_semantics=("parallel",),   # grid steps are row-independent
        vmem_limit_bytes=vmem_limit)

    x_spec = pl.BlockSpec((bt, s, d), lambda i: (i, 0, 0))
    xk_spec = pl.BlockSpec((bt, sp, dp), lambda i: (i, 0, 0))
    w1_spec = pl.BlockSpec((dp, cp), lambda i: (0, 0))
    w2_spec = pl.BlockSpec((cp, cp), lambda i: (0, 0))
    stats_spec = pl.BlockSpec((1, 2, cp), lambda i: (i, 0, 0))
    stats_shape = jax.ShapeDtypeStruct((nt, 2, cp), jnp.float32)

    mm1_flops = 2 * bp * sp * dp * cp
    mm2_flops = 2 * bp * sp * cp * cp
    w_bytes = (dp * cp + cp * cp) * 2
    xk_bytes = bp * sp * dp * 2

    # --- pass 1: fused pad/cast of x + batch statistics of h1 = X @ W1 ------
    xk, stats1 = pl.pallas_call(
        functools.partial(_pass1_kernel, b_total=B),
        out_shape=(jax.ShapeDtypeStruct((bp, sp, dp), jnp.bfloat16), stats_shape),
        grid=(nt,),
        in_specs=[x_spec, w1_spec],
        out_specs=(xk_spec, stats_spec),
        compiler_params=cparams,
        cost_estimate=pl.CostEstimate(
            flops=mm1_flops, transcendentals=0,
            bytes_accessed=B * s * d * 4 + xk_bytes + dp * cp * 2 + nt * 2 * cp * 4),
    )(x3, params["w1"])
    scale1, shift1 = _fold_bn(stats1, params["gamma1"], params["beta1"], n_elems)
    bn1 = jnp.stack([scale1, shift1], axis=0)                # (2, cp)

    # --- pass 2: batch statistics of h2 = relu(bn1(h1)) @ W2 ----------------
    stats2 = pl.pallas_call(
        functools.partial(_pass2_kernel, b_total=B, s_valid=s),
        out_shape=stats_shape,
        grid=(nt,),
        in_specs=[xk_spec, w1_spec, w2_spec,
                  pl.BlockSpec((2, cp), lambda i: (0, 0))],
        out_specs=stats_spec,
        compiler_params=cparams,
        cost_estimate=pl.CostEstimate(
            flops=mm1_flops + mm2_flops, transcendentals=0,
            bytes_accessed=xk_bytes + w_bytes + nt * 2 * cp * 4),
    )(xk, params["w1"], params["w2"], bn1)
    scale2, shift2 = _fold_bn(stats2, params["gamma2"], params["beta2"], n_elems)
    bn_all = jnp.stack([scale1, shift1, scale2, shift2], axis=0)   # (4, cp)

    # --- pass 3: y2 and max over the length axis s --------------------------
    out = pl.pallas_call(
        functools.partial(_pass3_kernel, s_valid=s),
        out_shape=jax.ShapeDtypeStruct((bp, cp), jnp.float32),
        grid=(nt,),
        in_specs=[xk_spec, w1_spec, w2_spec,
                  pl.BlockSpec((4, cp), lambda i: (0, 0))],
        out_specs=pl.BlockSpec((bt, cp), lambda i: (i, 0)),
        compiler_params=cparams,
        cost_estimate=pl.CostEstimate(
            flops=mm1_flops + mm2_flops, transcendentals=0,
            bytes_accessed=xk_bytes + w_bytes + bp * cp * 4),
    )(xk, params["w1"], params["w2"], bn_all)

    # strip padding, restore PyTorch output layout (b, C, n)
    return out[:B, :C].reshape(b, n, C).transpose(0, 2, 1)


# ---------------------------------------------------------------------------
# Pure-JAX f32 reference (training-mode BN), for a sanity check only
# ---------------------------------------------------------------------------
def _reference(x, w1, w2, g1, b1, g2, b2, eps=_EPS):
    b, n, s, d = x.shape
    C = w1.shape[0]
    X = x.reshape(b * n, s, d).astype(jnp.float32)
    h1 = jnp.einsum("bsd,cd->bsc", X, w1.astype(jnp.float32))
    m1 = h1.mean(axis=(0, 1))
    v1 = h1.var(axis=(0, 1))
    y1 = jnp.maximum((h1 - m1) * jax.lax.rsqrt(v1 + eps) * g1 + b1, 0.0)
    h2 = jnp.einsum("bsc,ec->bse", y1, w2.astype(jnp.float32))
    m2 = h2.mean(axis=(0, 1))
    v2 = h2.var(axis=(0, 1))
    y2 = jnp.maximum((h2 - m2) * jax.lax.rsqrt(v2 + eps) * g2 + b2, 0.0)
    return y2.max(axis=1).reshape(b, n, C).transpose(0, 2, 1)


if __name__ == "__main__":
    # Small deterministic example: b=2 samples, n=7 neighborhoods, s=10 points,
    # in_channels d=32, out_channels C=64. (B=14 and s=10 deliberately exercise
    # the batch-row and length padding paths fixed in this version.)
    b, n, s, d, C = 2, 7, 10, 32, 64

    key = jax.random.PRNGKey(0)
    kx, kw1, kw2 = jax.random.split(key, 3)

    x = jax.random.normal(kx, (b, n, s, d), dtype=jnp.float32)
    # Conv1d kernel_size=1, bias=False -> weight (out, in); BN init gamma=1, beta=0.
    w1 = 0.1 * jax.random.normal(kw1, (C, d), dtype=jnp.float32)
    w2 = 0.1 * jax.random.normal(kw2, (C, C), dtype=jnp.float32)
    gamma1 = jnp.ones((C,), jnp.float32)
    beta1 = jnp.zeros((C,), jnp.float32)
    gamma2 = jnp.ones((C,), jnp.float32)
    beta2 = jnp.zeros((C,), jnp.float32)

    params = prepare_local_op_params(w1, w2, gamma1, beta1, gamma2, beta2)
    y = jax.block_until_ready(local_op(x, params))

    assert y.shape == (b, C, n), y.shape
    assert bool(jnp.all(jnp.isfinite(y)))

    # Generous tolerance: kernel feeds the MXU in bf16 (f32 accumulation).
    y_ref = _reference(x, w1, w2, gamma1, beta1, gamma2, beta2)
    assert bool(jnp.allclose(y, y_ref, atol=1e-1, rtol=1e-1)), float(
        jnp.max(jnp.abs(y - y_ref)))

    print("KERNEL_OK")
</pallas_src>

<mosaic_0001>
module attributes {stable_mosaic.version = 11 : i64} {
  func.func @_pass1_kernel(%arg0: i32, %arg1: memref<8x10x32xf32, #tpu.memory_space<vmem>>, %arg2: memref<32x128xbf16, #tpu.memory_space<vmem>>, %arg3: memref<8x16x32xbf16, #tpu.memory_space<vmem>>, %arg4: memref<1x2x128xf32, #tpu.memory_space<vmem>>) attributes {dimension_semantics = [#tpu.dimension_semantics<parallel>], iteration_bounds = array<i64: 2>, scalar_prefetch = 0 : i64, scratch_operands = 0 : i64, tpu.core_type = #tpu.core_type<tc>, window_params = [{transform_indices = @transform_0, window_bounds = array<i64: 8, 10, 32>}, {pipeline_mode = #tpu.pipeline_mode<synchronous>, transform_indices = @transform_1, window_bounds = array<i64: 32, 128>}, {transform_indices = @transform_2, window_bounds = array<i64: 8, 16, 32>}, {transform_indices = @transform_3, window_bounds = array<i64: 1, 2, 128>}]} {
    %c0 = arith.constant 0 : index
    %c0_0 = arith.constant 0 : index
    %c0_1 = arith.constant 0 : index
    %0 = vector.load %arg1[%c0, %c0_0, %c0_1] : memref<8x10x32xf32, #tpu.memory_space<vmem>>, vector<8x10x32xf32>
    %c8_i32 = arith.constant 8 : i32
    %1 = arith.muli %arg0, %c8_i32 : i32
    %2 = tpu.iota {dimensions = array<i32: 0>} : vector<8x1x1xi32>
    %3 = vector.broadcast %1 : i32 to vector<8x1x1xi32>
    %4 = arith.addi %3, %2 : vector<8x1x1xi32>
    %c14_i32 = arith.constant 14 : i32
    %5 = vector.broadcast %c14_i32 : i32 to vector<8x1x1xi32>
    %6 = arith.cmpi slt, %4, %5 : vector<8x1x1xi32>
    %cst = arith.constant 0.000000e+00 : f32
    %7 = vector.shape_cast %6 : vector<8x1x1xi1> to vector<8x1x1xi1>
    %8 = vector.broadcast %7 : vector<8x1x1xi1> to vector<8x10x32xi1>
    %9 = vector.broadcast %cst : f32 to vector<8x10x32xf32>
    %10 = arith.select %8, %0, %9 : vector<8x10x32xi1>, vector<8x10x32xf32>
    %11 = arith.truncf %10 : vector<8x10x32xf32> to vector<8x10x32xbf16>
    %cst_2 = arith.constant 0.000000e+00 : bf16
    %12 = vector.broadcast %cst_2 : bf16 to vector<8x16x32xbf16>
    %c0_3 = arith.constant 0 : index
    %c0_4 = arith.constant 0 : index
    %c0_5 = arith.constant 0 : index
    %13 = vector.load %arg3[%c0_3, %c0_4, %c0_5] : memref<8x16x32xbf16, #tpu.memory_space<vmem>>, vector<8x16x32xbf16>
    tpu.vector_store %arg3[%c0_3, %c0_4, %c0_5], %12 {strides = array<i32>} : memref<8x16x32xbf16, #tpu.memory_space<vmem>>, vector<8x16x32xbf16>,
    %c0_6 = arith.constant 0 : index
    %c0_7 = arith.constant 0 : index
    %c0_8 = arith.constant 0 : index
    %14 = vector.load %arg3[%c0_6, %c0_7, %c0_8] : memref<8x16x32xbf16, #tpu.memory_space<vmem>>, vector<8x10x32xbf16>
    tpu.vector_store %arg3[%c0_6, %c0_7, %c0_8], %11 {strides = array<i32>} : memref<8x16x32xbf16, #tpu.memory_space<vmem>>, vector<8x10x32xbf16>,
    %c0_9 = arith.constant 0 : index
    %c0_10 = arith.constant 0 : index
    %c0_11 = arith.constant 0 : index
    %15 = vector.load %arg3[%c0_9, %c0_10, %c0_11] : memref<8x16x32xbf16, #tpu.memory_space<vmem>>, vector<8x16x32xbf16>
    %16 = vector.shape_cast %15 : vector<8x16x32xbf16> to vector<128x32xbf16>
    %c0_12 = arith.constant 0 : index
    %c0_13 = arith.constant 0 : index
    %17 = vector.load %arg2[%c0_12, %c0_13] : memref<32x128xbf16, #tpu.memory_space<vmem>>, vector<32x128xbf16>
    %cst_14 = arith.constant dense<0.000000e+00> : vector<128x128xf32>
    %18 = tpu.matmul %16, %17, %cst_14 {dimension_numbers = #tpu.dot_dimension_numbers<[1], [0], [0], [1], [0, 0, 1, 1], [], []>} : vector<128x32xbf16>, vector<32x128xbf16>, vector<128x128xf32> -> vector<128x128xf32>
    %cst_15 = arith.constant dense<0.000000e+00> : vector<128xf32>
    %19 = vector.multi_reduction <add>, %18, %cst_15 [0] : vector<128x128xf32> to vector<128xf32>
    %20 = vector.shape_cast %19 : vector<128xf32> to vector<1x128xf32>
    %21 = vector.shape_cast %20 : vector<1x128xf32> to vector<1x1x128xf32>
    %c0_16 = arith.constant 0 : index
    %c0_17 = arith.constant 0 : index
    %c0_18 = arith.constant 0 : index
    %22 = vector.load %arg4[%c0_16, %c0_17, %c0_18] : memref<1x2x128xf32, #tpu.memory_space<vmem>>, vector<1x1x128xf32>
    tpu.vector_store %arg4[%c0_16, %c0_17, %c0_18], %21 {strides = array<i32>} : memref<1x2x128xf32, #tpu.memory_space<vmem>>, vector<1x1x128xf32>,
    %23 = arith.mulf %18, %18 : vector<128x128xf32>
    %cst_19 = arith.constant dense<0.000000e+00> : vector<128xf32>
    %24 = vector.multi_reduction <add>, %23, %cst_19 [0] : vector<128x128xf32> to vector<128xf32>
    %25 = vector.shape_cast %24 : vector<128xf32> to vector<1x128xf32>
    %26 = vector.shape_cast %25 : vector<1x128xf32> to vector<1x1x128xf32>
    %c0_20 = arith.constant 0 : index
    %c1 = arith.constant 1 : index
    %c0_21 = arith.constant 0 : index
    %27 = vector.load %arg4[%c0_20, %c1, %c0_21] : memref<1x2x128xf32, #tpu.memory_space<vmem>>, vector<1x1x128xf32>
    tpu.vector_store %arg4[%c0_20, %c1, %c0_21], %26 {strides = array<i32>} : memref<1x2x128xf32, #tpu.memory_space<vmem>>, vector<1x1x128xf32>,
    return
  }
  func.func @transform_0(%arg0: i32) -> (i32, i32, i32) {
    %c0_i32 = arith.constant 0 : i32
    %c0_i32_0 = arith.constant 0 : i32
    %c0_i32_1 = arith.constant 0 : i32
    return %arg0, %c0_i32, %c0_i32_0 : i32, i32, i32
  }
  func.func @transform_1(%arg0: i32) -> (i32, i32) {
    %c0_i32 = arith.constant 0 : i32
    %c0_i32_0 = arith.constant 0 : i32
    %c0_i32_1 = arith.constant 0 : i32
    return %c0_i32, %c0_i32_0 : i32, i32
  }
  func.func @transform_2(%arg0: i32) -> (i32, i32, i32) {
    %c0_i32 = arith.constant 0 : i32
    %c0_i32_0 = arith.constant 0 : i32
    %c0_i32_1 = arith.constant 0 : i32
    return %arg0, %c0_i32, %c0_i32_0 : i32, i32, i32
  }
  func.func @transform_3(%arg0: i32) -> (i32, i32, i32) {
    %c0_i32 = arith.constant 0 : i32
    %c0_i32_0 = arith.constant 0 : i32
    %c0_i32_1 = arith.constant 0 : i32
    return %arg0, %c0_i32, %c0_i32_0 : i32, i32, i32
  }
}

</mosaic_0001>

<bundles_post_ra>
// kernel: tpu_custom_call.1
= control target key start
LH: loop header
LB: loop body
LE: loop exit
PB: predicated region body
PF: predicated region fallthrough
CT: control target
= control target key end

     0   :  { %9 = vsyncpa [#allocation3], 0  ;;  %s1301_s0 = inlined_call_operand.vmem [shape: f32[14,10,32], index: 0, kind: input, shape index: {}]   ;;  %s1302_s1 = inlined_call_operand.vmem [shape: bf16[32,128], index: 1, kind: input, shape index: {}]   ;;  %s1303_s2 = inlined_call_operand.hbm [shape: bf16[16,16,32], index: 2, kind: output, shape index: {0}]   ;;  %s1304_s3 = inlined_call_operand.hbm [shape: f32[2,2,128], index: 3, kind: output, shape index: {1}]  }
   0x1   :  { %11 = vsyncpa [#allocation3 + $0x1], 0 }
   0x2   :  { %12 = vsyncpa [#allocation5], 0 }
   0x3   :  { %14 = vsyncpa [#allocation5 + $0x1], 0  ;;  %s1038_s12 = smov 0   ;;  %s1040_s13 = smov 0  }
   0x4   :  { %s1042_s14 = smov 0   ;;  %s1044_s15 = smov 0  }
   0x5 LB: > { %s1059_s16 = sadd.s32 4294967295, %s1011_s15   ;;  %s756_s17 = sadd.s32 4294967294, %s1011_s15   ;;  %s1011_s15 = sphi %s1044_s15, %s1310_s15   ;;  %s1007_s14 = sphi %s1042_s14, %s1309_s14   ;;  %s1003_s13 = sphi %s1040_s13, %s1308_s13   ;;  %s999_s12 = sphi %s1038_s12, %s1307_s12  }
   0x6   : > { %s1063_s18 = sadd.s32 1, %s1011_s15   ;;  %s74_s19 = sadd.s32 1, %s1007_s14 }
   0x7   : > { %s71_s20 = ssub.s32 %s1011_s15, %s1063_s18  ;;  %p84_p0 = scmp.ne.s32.totalorder %s1007_s14, %s1003_s13 }
   0x8   : > { %p72_p1 = scmp.eq.s32.totalorder %s71_s20, 0  ;;  %p85_p2 = scmp.eq.s32.totalorder %s1059_s16, 1 }
   0x9   : > { %p90_p3 = scmp.ne.s32.totalorder %s1003_s13, %s999_s12  ;;  %p91_p4 = scmp.eq.s32.totalorder %s756_s17, 1 }
   0xa   : > { %s1074_s21 = scalar_select %p72_p1, %s1007_s14, %s74_s19  }
   0xb   : > { %p1076_p5 = por %p85_p2, %p84_p0  ;;  %p1080_p6 = por %p91_p4, %p90_p3 }
   0xc   : > { %p759_p7 = scmp.ge.s32.totalorder %s1011_s15, 1  ;;  %p158_p8 = scmp.lt.s32.totalorder %s1011_s15, 3 }
   0xe   : > { %p159_p9 = pnand %p759_p7, %p158_p8 }
   0xf   : > { %s1090_s26 = sand.u32 (!%p159_p9), 1, %s1003_s13   ;;  %s1097_s30 = sshll.u32 (!%p159_p9), %s1059_s16, 3 }
  0x10   : > { %162 = sbr.rel (%p159_p9) target bundleno = 300 (0x12c), region = 28  ;;  %s760_s29 = sshll.u32 (!%p159_p9), %s1090_s26, 6 }
  0x11   : > { %p199_p10 = scmp.lt.s32.totalorder (!%p159_p9), %s1097_s30, 13  ;;  %p910_p11 = scmp.lt.s32.totalorder (!%p159_p9), %s1097_s30, 14 }
  0x12   : > { %s1102_s4 = scalar_lea.vmem (!%p159_p9), [#allocation2], %s760_s29  ;;  %s826_s11 = sshll.u32 (!%p159_p9), %s1059_s16, 10 }
  0x13   : > { %s1238_s20 = scalar_lea.hbm (!%p159_p9), %s1303_s2, %s826_s11  ;;  %s649_s24 = sshll.u32 (!%p159_p9), %s1102_s4, 4  ;;  %s1241_s24 = int_to_ptr.vmem [resolvable:$true] %s649_s24 }
  0x14   : > { %s630_s25 = scalar_lea.sflag (!%p159_p9), [#allocation3], %s1090_s26  ;;  %s921_s27 = scalar_lea.vmem (!%p159_p9), %s1241_s24, 1024 }
  0x15   : > { %v908_v0 = vld [vmem:[%s1302_s1 + $0x8] sm:$0xff]   ;;  %v909_v1 = vld [vmem:[%s1302_s1] sm:$0xff]   ;;  %vm285_vm0 = vcmask 257024   ;;  %v229_v2 = vstv %s1097_s30  ;;  %v1013_v3 = vmov 0   ;;  %s200_s5 = scalar_select %p199_p10, %s1097_s30, 13  ;;  %vm359_vm2 = vcmask 253952  }
  0x16   : > { %837 = vmatprep.subr.bf16.mxu0 %v908_v0  ;;  %857 = vmatprep.subr.bf16.mxu1 %v908_v0  ;;  %286 = vst.msk [vmem:[%s1102_s4] sm:$0xf] %vm285_vm0, %v1013_v3  ;;  %287 = vst.msk [vmem:[%s1102_s4 + $0x4] sm:$0xf] %vm285_vm0, %v1013_v3  ;;  %v230_v4 = vadd.s32 1, %v229_v2  ;;  %v231_v5 = vadd.s32 2, %v229_v2  ;;  %p922_p12 = scmp.ne.s32.totalorder %s1241_s24, %s921_s27 }
  0x17   : > { %838 = vmatpush3.bf16.msra.mxu0 %v908_v0  ;;  %288 = vst.msk [vmem:[%s1102_s4 + $0x8] sm:$0xf] %vm285_vm0, %v1013_v3  ;;  %289 = vst.msk [vmem:[%s1102_s4 + $0xc] sm:$0xf] %vm285_vm0, %v1013_v3  ;;  %859 = vmatpush3.bf16.msra.mxu1 %v908_v0  ;;  %v232_v6 = vadd.s32 3, %v229_v2  ;;  %v233_v7 = vadd.s32 4, %v229_v2 }
  0x18   : > { %290 = vst.msk [vmem:[%s1102_s4 + $0x10] sm:$0xf] %vm285_vm0, %v1013_v3  ;;  %291 = vst.msk [vmem:[%s1102_s4 + $0x14] sm:$0xf] %vm285_vm0, %v1013_v3  ;;  %839 = vmatprep.subr.bf16.mxu0 %v909_v1  ;;  %858 = vmatprep.subr.bf16.mxu1 %v909_v1  ;;  %v234_v8 = vadd.s32 5, %v229_v2  ;;  %v1139_v9 = vadd.s32 6, %v229_v2  ;;  %p923_p13 = pnand %p922_p12, %p1076_p5 }
  0x19   : > { %292 = vst.msk [vmem:[%s1102_s4 + $0x18] sm:$0xf] %vm285_vm0, %v1013_v3  ;;  %293 = vst.msk [vmem:[%s1102_s4 + $0x1c] sm:$0xf] %vm285_vm0, %v1013_v3  ;;  %v1141_v10 = vadd.s32 7, %v229_v2  ;;  %s808_s7 = sshll.u32 %s200_s5, 4 }
  0x1a   : > { %294 = vst.msk [vmem:[%s1102_s4 + $0x20] sm:$0xf] %vm285_vm0, %v1013_v3  ;;  %295 = vst.msk [vmem:[%s1102_s4 + $0x24] sm:$0xf] %vm285_vm0, %v1013_v3  ;;  %s911_s6 = scalar_select %p910_p11, 255, 0 }
  0x1b   : > { %296 = vst.msk [vmem:[%s1102_s4 + $0x28] sm:$0xf] %vm285_vm0, %v1013_v3  ;;  %297 = vst.msk [vmem:[%s1102_s4 + $0x2c] sm:$0xf] %vm285_vm0, %v1013_v3  ;;  %840 = vmatpush3.bf16.msra.mxu0 %v909_v1  ;;  %vm237_vm1 = vcmp.lt.s32.totalorder %v229_v2, 14  ;;  %vm238_vm3 = vcmp.lt.s32.totalorder %v230_v4, 14  ;;  %860 = vmatpush3.bf16.msra.mxu1 %v909_v1  ;;  %s1148_s10 = scalar_lea.vmem %s1301_s0, %s808_s7  ;;  %p924_p0 = pneg %p923_p13 }
  0x1c   : > { %298 = vst.msk [vmem:[%s1102_s4 + $0x30] sm:$0xf] %vm285_vm0, %v1013_v3  ;;  %299 = vst.msk [vmem:[%s1102_s4 + $0x34] sm:$0xf] %vm285_vm0, %v1013_v3  ;;  %vm239_vm4 = vcmp.lt.s32.totalorder %v231_v5, 14  ;;  %vm240_vm5 = vcmp.lt.s32.totalorder %v232_v6, 14 }
  0x1d   : > { %300 = vst.msk [vmem:[%s1102_s4 + $0x38] sm:$0xf] %vm285_vm0, %v1013_v3  ;;  %301 = vst.msk [vmem:[%s1102_s4 + $0x3c] sm:$0xf] %vm285_vm0, %v1013_v3  ;;  %vm241_vm6 = vcmp.lt.s32.totalorder %v233_v7, 14  ;;  %vm242_vm7 = vcmp.lt.s32.totalorder %v234_v8, 14 }
  0x1e   : > { %v213_v11 = vld [vmem:[%s1148_s10 + $0x8] sm:$0x3]  ;;  %v912_v12 = vld [vmem:[%s1148_s10] sm:%s911_s6]  ;;  %v214_v13 = vld [vmem:[%s1148_s10 + $0x10] sm:$0xff]  ;;  %vm243_vm8 = vcmp.lt.s32.totalorder %v1139_v9, 14  ;;  %vm244_vm9 = vcmp.lt.s32.totalorder %v1141_v10, 14 }
  0x1f   : > { %v262_v14 = vsel %vm237_vm1, %v213_v11, 0.0  ;;  %v809_v15 = vpack.c.bf16 %v912_v12, %v912_v12  ;;  %v215_v16 = vld [vmem:[%s1148_s10 + $0x18] sm:$0x3]  ;;  %v263_v17 = vsel %vm238_vm3, %v214_v13, 0.0  ;;  %v216_v18 = vld [vmem:[%s1148_s10 + $0x20] sm:$0xff]  ;;  %v218_v19 = vld [vmem:[%s1148_s10 + $0x30] sm:$0xff] }
  0x20   : > { %v810_v20 = vpack.c.bf16 %v262_v14, %v262_v14  ;;  %v264_v21 = vsel %vm238_vm3, %v215_v16, 0.0  ;;  %v811_v22 = vpack.c.bf16 %v263_v17, %v263_v17  ;;  %v217_v23 = vld [vmem:[%s1148_s10 + $0x28] sm:$0x3]  ;;  %v265_v24 = vsel %vm239_vm4, %v216_v18, 0.0  ;;  %v219_v25 = vld [vmem:[%s1148_s10 + $0x38] sm:$0x3] }
  0x21   : > { %358 = vst.msk [vmem:[%s1102_s4] sm:$0xf] %vm285_vm0, %v809_v15  ;;  %v812_v26 = vpack.c.bf16 %v264_v21, %v264_v21  ;;  %v266_v27 = vsel %vm239_vm4, %v217_v23, 0.0  ;;  %v813_v28 = vpack.c.bf16 %v265_v24, %v265_v24  ;;  %v267_v29 = vsel %vm240_vm5, %v218_v19, 0.0  ;;  %v220_v30 = vld [vmem:[%s1148_s10 + $0x40] sm:$0xff]  ;;  %v222_v32 = vld [vmem:[%s1148_s10 + $0x50] sm:$0xff] }
  0x22   : > { %v221_v31 = vld [vmem:[%s1148_s10 + $0x48] sm:$0x3]  ;;  %360 = vst.msk [vmem:[%s1102_s4 + $0x4] sm:$0x1] %vm359_vm2, %v810_v20  ;;  %v814_v33 = vpack.c.bf16 %v266_v27, %v266_v27  ;;  %v268_v34 = vsel %vm240_vm5, %v219_v25, 0.0  ;;  %v815_v35 = vpack.c.bf16 %v267_v29, %v267_v29  ;;  %v269_v36 = vsel %vm241_vm6, %v220_v30, 0.0 }
  0x23   : > { %361 = vst.msk [vmem:[%s1102_s4 + $0x8] sm:$0xf] %vm285_vm0, %v811_v22  ;;  %v223_v37 = vld [vmem:[%s1148_s10 + $0x58] sm:$0x3]  ;;  %v224_v38 = vld [vmem:[%s1148_s10 + $0x60] sm:$0xff]  ;;  %v226_v39 = vld [vmem:[%s1148_s10 + $0x70] sm:$0xff]  ;;  %v816_v40 = vpack.c.bf16 %v268_v34, %v268_v34  ;;  %v817_v42 = vpack.c.bf16 %v269_v36, %v269_v36 }
  0x24   : > { %362 = vst.msk [vmem:[%s1102_s4 + $0xc] sm:$0x1] %vm359_vm2, %v812_v26  ;;  %v270_v41 = vsel %vm241_vm6, %v221_v31, 0.0  ;;  %v271_v43 = vsel %vm242_vm7, %v222_v32, 0.0  ;;  %v225_v44 = vld [vmem:[%s1148_s10 + $0x68] sm:$0x3] }
  0x25   : > { %363 = vst.msk [vmem:[%s1102_s4 + $0x10] sm:$0xf] %vm285_vm0, %v813_v28  ;;  %v227_v45 = vld [vmem:[%s1148_s10 + $0x78] sm:$0x3]  ;;  %365 = vst.msk [vmem:[%s1102_s4 + $0x18] sm:$0xf] %vm285_vm0, %v815_v35  ;;  %v818_v46 = vpack.c.bf16 %v270_v41, %v270_v41  ;;  %v819_v48 = vpack.c.bf16 %v271_v43, %v271_v43 }
  0x26   : > { %364 = vst.msk [vmem:[%s1102_s4 + $0x14] sm:$0x1] %vm359_vm2, %v814_v33  ;;  %v272_v47 = vsel %vm242_vm7, %v223_v37, 0.0  ;;  %v273_v49 = vsel %vm243_vm8, %v224_v38, 0.0  ;;  %366 = vst.msk [vmem:[%s1102_s4 + $0x1c] sm:$0x1] %vm359_vm2, %v816_v40 }
  0x27   : > { %367 = vst.msk [vmem:[%s1102_s4 + $0x20] sm:$0xf] %vm285_vm0, %v817_v42  ;;  %v820_v50 = vpack.c.bf16 %v272_v47, %v272_v47  ;;  %v274_v51 = vsel %vm243_vm8, %v225_v44, 0.0  ;;  %v821_v52 = vpack.c.bf16 %v273_v49, %v273_v49  ;;  %v275_v53 = vsel %vm244_vm9, %v226_v39, 0.0  ;;  %369 = vst.msk [vmem:[%s1102_s4 + $0x28] sm:$0xf] %vm285_vm0, %v819_v48 }
  0x28   : > { %368 = vst.msk [vmem:[%s1102_s4 + $0x24] sm:$0x1] %vm359_vm2, %v818_v46  ;;  %v822_v54 = vpack.c.bf16 %v274_v51, %v274_v51  ;;  %v276_v55 = vsel %vm244_vm9, %v227_v45, 0.0  ;;  %v823_v56 = vpack.c.bf16 %v275_v53, %v275_v53  ;;  %vm447_vm10 = vcmask 261120   ;;  %s1014_s28 = smov [#allocation2]  }
  0x29   : > { %370 = vst.msk [vmem:[%s1102_s4 + $0x2c] sm:$0x1] %vm359_vm2, %v820_v50  ;;  %v824_v57 = vpack.c.bf16 %v276_v55, %v276_v55  ;;  %v913_v58 = vld [vmem:[%s1102_s4] sm:$0xff]   ;;  %s925_s29 = sshll.u32 %s1014_s28, 4  ;;  %s926_s29 = int_to_ptr.vmem [resolvable:$false] %s925_s29 }
  0x2a   : > { %371 = vst.msk [vmem:[%s1102_s4 + $0x30] sm:$0xf] %vm285_vm0, %v821_v52  ;;  %373 = vst.msk [vmem:[%s1102_s4 + $0x38] sm:$0xf] %vm285_vm0, %v823_v56  ;;  %841 = vmatprep.mubr.msk.bf16.mxu0 %vm447_vm10, %v913_v58  ;;  %s927_s30 = scalar_lea.vmem %s926_s29, 2048  ;;  %p928_p1 = scmp.lt.s32.totalorder %s1241_s24, %s926_s29 }
  0x2b   : > { %372 = vst.msk [vmem:[%s1102_s4 + $0x34] sm:$0x1] %vm359_vm2, %v822_v54  ;;  %374 = vst.msk [vmem:[%s1102_s4 + $0x3c] sm:$0x1] %vm359_vm2, %v824_v57  ;;  %v914_v59 = vld [vmem:[%s1102_s4 + $0x8] sm:$0xff]   ;;  %p929_p2 = scmp.lt.s32.totalorder %s927_s30, %s921_s27 }
  0x2c   : > { %842 = vmatmul.mubr.msk.bf16.vlgmr.msra.gmra.mxu0 %vm447_vm10, %v914_v59 }
  0x2d   : > { %v915_v60 = vld [vmem:[%s1102_s4 + $0x10] sm:$0xff]   ;;  %v916_v0 = vld [vmem:[%s1102_s4 + $0x18] sm:$0xff]   ;;  %p930_p3 = por %p929_p2, %p928_p1 }
  0x2e   : > { %845 = vmatprep.mubr.msk.bf16.mxu0 %vm447_vm10, %v915_v60 }
  0x2f   : > { %v917_v61 = vld [vmem:[%s1102_s4 + $0x20] sm:$0xff]   ;;  %p931_p4 = pnand %p930_p3, %p924_p0 }
  0x30   : > { %v918_v62 = vld [vmem:[%s1102_s4 + $0x28] sm:$0xff]   ;;  %849 = vmatprep.mubr.msk.bf16.mxu1 %vm447_vm10, %v917_v61 }
  0x31   : > { %850 = vmatmul.mubr.msk.bf16.vlgmr.msra.gmra.mxu1 %vm447_vm10, %v918_v62 }
  0x32   : > { %v919_v63 = vld [vmem:[%s1102_s4 + $0x30] sm:$0xff]   ;;  %v920_v1 = vld [vmem:[%s1102_s4 + $0x38] sm:$0xff]  }
  0x33   : > { %853 = vmatprep.mubr.msk.bf16.mxu1 %vm447_vm10, %v919_v63 }
  0x34   : > { %846 = vmatmul.mubr.msk.bf16.gmra.mxu0 %vm447_vm10, %v916_v0 }
  0x39   : > { %854 = vmatmul.mubr.msk.bf16.gmra.mxu1 %vm447_vm10, %v920_v1 }
  0x3a   : > { %934 = shalt.err (!%p931_p4)
}
  0x3b   : > { %s935_s4 = scalar_lea.hbm %s1238_s20, 1024  ;;  %s939_s7 = scalar_lea.hbm %s1303_s2, 2048 }
  0x3c   : > { %p936_p7 = scmp.ne.s32.totalorder %s1238_s20, %s935_s4  ;;  %p940_p10 = scmp.lt.s32.totalorder %s1238_s20, %s1303_s2 }
  0x3d   : > { %p941_p11 = scmp.lt.s32.totalorder %s939_s7, %s935_s4 }
  0x3e   : > { %p937_p8 = pnand %p936_p7, %p1076_p5 }
  0x3f   : > { %p942_p12 = por %p941_p11, %p940_p10 }
  0x40   : > { %p938_p9 = pneg %p937_p8 }
  0x42   : > { %p943_p13 = pnand %p942_p12, %p938_p9 }
  0x44   : > { %946 = shalt.err (!%p943_p13)
}
  0x45   : > { %s1015_s10 = smov 64   ;;  %s1016_s11 = smov 4  }
  0x46   : > { %861 = dma.vmem_to_hbm [thread:$0]  (%p1076_p5), %s1241_s24, 1024, %s1238_s20, %s630_s25, %s1015_s10, %s1015_s10, %s1016_s11  }
  0x47   : > { %s761_s17 = sshll.u32 %s1090_s26, 1  ;;  %s805_s19 = sshll.u32 %s1059_s16, 5 }
  0x48   : > { %s192_s20 = scalar_lea.vmem [#allocation4], %s761_s17  ;;  %s663_s28 = scalar_lea.hbm %s1304_s3, %s805_s19 }
  0x49   : > { %s665_s24 = sshll.u32 %s192_s20, 4  ;;  %s635_s29 = scalar_lea.sflag [#allocation5], %s1090_s26  ;;  %s666_s24 = int_to_ptr.vmem [resolvable:$true] %s665_s24 }
  0x4a   : > { %s947_s30 = scalar_lea.vmem %s666_s24, 32  ;;  %s1017_s4 = smov [#allocation4]  }
  0x4b   : > { %p948_p0 = scmp.ne.s32.totalorder %s666_s24, %s947_s30  ;;  %s951_s16 = sshll.u32 %s1017_s4, 4  ;;  %s952_s16 = int_to_ptr.vmem [resolvable:$false] %s951_s16 }
  0x4c   : > { %s953_s5 = scalar_lea.vmem %s952_s16, 64  ;;  %p954_p3 = scmp.lt.s32.totalorder %s666_s24, %s952_s16 }
  0x4d   : > { %p949_p1 = pnand %p948_p0, %p1076_p5  ;;  %p955_p4 = scmp.lt.s32.totalorder %s953_s5, %s947_s30 }
  0x4f   : > { %p950_p2 = pneg %p949_p1  ;;  %p956_p7 = por %p955_p4, %p954_p3 }
  0x51   : > { %p957_p8 = pnand %p956_p7, %p950_p2 }
  0xec   : > { %v843_v2 = vpop.f32.mrf.mxu0 }
  0xed   : > { %v593_v13 = vmul.f32 %v843_v2, %v843_v2 }
  0xee   : > { %v506_v3 = vpop.f32.mrf.mxu0 }
  0xef   : > { %v591_v8 = vmul.f32 %v506_v3, %v506_v3 }
  0xf0   : > { %v844_v4 = vpop.f32.mrf.mxu0 }
  0xf1   : > { %v851_v5 = vpop.f32.mrf.mxu1  ;;  %v594_v17 = vmul.f32 %v844_v4, %v844_v4 }
  0xf2   : > { %v509_v6 = vpop.f32.mrf.mxu0  ;;  %v601_v44 = vmul.f32 %v851_v5, %v851_v5 }
  0xf3   : > { %v538_v7 = vpop.f32.mrf.mxu1  ;;  %v569_v9 = vadd.f32 %v509_v6, %v506_v3  ;;  %v592_v10 = vmul.f32 %v509_v6, %v509_v6 }
  0xf4   : > { %v847_v11 = vpop.f32.mrf.mxu0  ;;  %v599_v37 = vmul.f32 %v538_v7, %v538_v7 }
  0xf5   : > { %v852_v12 = vpop.f32.mrf.mxu1  ;;  %v570_v14 = vadd.f32 %v843_v2, %v569_v9  ;;  %v607_v15 = vadd.f32 %v592_v10, %v591_v8  ;;  %v597_v30 = vmul.f32 %v847_v11, %v847_v11 }
  0xf6   : > { %v522_v16 = vpop.f32.mrf.mxu0  ;;  %v602_v47 = vmul.f32 %v852_v12, %v852_v12 }
  0xf7   : > { %v608_v18 = vadd.f32 %v607_v15, %v593_v13  ;;  %v571_v19 = vadd.f32 %v844_v4, %v570_v14  ;;  %v541_v21 = vpop.f32.mrf.mxu1  ;;  %v595_v23 = vmul.f32 %v522_v16, %v522_v16 }
  0xf8   : > { %v848_v20 = vpop.f32.mrf.mxu0  ;;  %v600_v41 = vmul.f32 %v541_v21, %v541_v21 }
  0xf9   : > { %v572_v22 = vadd.f32 %v571_v19, %v522_v16  ;;  %v609_v24 = vadd.f32 %v608_v18, %v594_v17  ;;  %v855_v29 = vpop.f32.mrf.mxu1  ;;  %v598_v33 = vmul.f32 %v848_v20, %v848_v20 }
  0xfa   : > { %v525_v25 = vpop.f32.mrf.mxu0  ;;  %v605_v57 = vmul.f32 %v855_v29, %v855_v29 }
  0xfb   : > { %v610_v26 = vadd.f32 %v609_v24, %v595_v23  ;;  %v573_v27 = vadd.f32 %v572_v22, %v525_v25  ;;  %v596_v28 = vmul.f32 %v525_v25, %v525_v25  ;;  %v554_v36 = vpop.f32.mrf.mxu1 }
  0xfc   : > { %v603_v52 = vmul.f32 %v554_v36, %v554_v36 }
  0xfd   : > { %v574_v31 = vadd.f32 %v847_v11, %v573_v27  ;;  %v611_v32 = vadd.f32 %v610_v26, %v596_v28  ;;  %v856_v43 = vpop.f32.mrf.mxu1 }
  0xfe   : > { %v606_v60 = vmul.f32 %v856_v43, %v856_v43 }
  0xff   : > { %v575_v34 = vadd.f32 %v848_v20, %v574_v31  ;;  %v612_v35 = vadd.f32 %v611_v32, %v597_v30  ;;  %v557_v50 = vpop.f32.mrf.mxu1 }
 0x100   : > { %v604_v56 = vmul.f32 %v557_v50, %v557_v50 }
 0x101   : > { %v613_v38 = vadd.f32 %v612_v35, %v598_v33  ;;  %v576_v39 = vadd.f32 %v575_v34, %v538_v7 }
 0x103   : > { %v577_v40 = vadd.f32 %v576_v39, %v541_v21  ;;  %v614_v42 = vadd.f32 %v613_v38, %v599_v37 }
 0x105   : > { %v578_v45 = vadd.f32 %v851_v5, %v577_v40  ;;  %v615_v46 = vadd.f32 %v614_v42, %v600_v41 }
 0x107   : > { %v616_v48 = vadd.f32 %v615_v46, %v601_v44  ;;  %v579_v49 = vadd.f32 %v852_v12, %v578_v45 }
 0x109   : > { %v580_v51 = vadd.f32 %v579_v49, %v554_v36  ;;  %v617_v53 = vadd.f32 %v616_v48, %v602_v47 }
 0x10b   : > { %v618_v54 = vadd.f32 %v617_v53, %v603_v52  ;;  %v581_v55 = vadd.f32 %v580_v51, %v557_v50 }
 0x10d   : > { %v582_v58 = vadd.f32 %v855_v29, %v581_v55  ;;  %v619_v59 = vadd.f32 %v618_v54, %v604_v56 }
 0x10f   : > { %v583_v61 = vadd.f32 %v856_v43, %v582_v58  ;;  %v620_v62 = vadd.f32 %v619_v59, %v605_v57 }
 0x111   : > { %v584_v63 = vrot.slane %v583_v61, 4  ;;  %v621_v0 = vadd.f32 %v620_v62, %v606_v60 }
 0x113   : > { %v585_v1 = vadd.f32 %v584_v63, %v583_v61  ;;  %v622_v2 = vrot.slane %v621_v0, 4 }
 0x115   : > { %v586_v3 = vrot.slane %v585_v1, 2  ;;  %v623_v4 = vadd.f32 %v622_v2, %v621_v0 }
 0x117   : > { %v587_v5 = vadd.f32 %v586_v3, %v585_v1  ;;  %v624_v6 = vrot.slane %v623_v4, 2 }
 0x119   : > { %v588_v7 = vrot.slane %v587_v5, 1  ;;  %v625_v8 = vadd.f32 %v624_v6, %v623_v4 }
 0x11b   : > { %v589_v9 = vadd.f32 %v588_v7, %v587_v5  ;;  %v626_v10 = vrot.slane %v625_v8, 1 }
 0x11d   : > { %590 = vst [vmem:[%s192_s20] sm:$0x1] %v589_v9  ;;  %v627_v11 = vadd.f32 %v626_v10, %v625_v8 }
 0x11f   : > { %628 = vst [vmem:[%s192_s20 + $0x1] sm:$0x1] %v627_v11 }
 0x120   : > { %960 = shalt.err (!%p957_p8)
}
 0x121   : > { %s961_s6 = scalar_lea.hbm %s663_s28, 32  ;;  %s965_s8 = scalar_lea.hbm %s1304_s3, 64 }
 0x122   : > { %p962_p9 = scmp.ne.s32.totalorder %s663_s28, %s961_s6  ;;  %p966_p12 = scmp.lt.s32.totalorder %s663_s28, %s1304_s3 }
 0x123   : > { %p967_p13 = scmp.lt.s32.totalorder %s965_s8, %s961_s6 }
 0x124   : > { %p963_p10 = pnand %p962_p9, %p1076_p5 }
 0x125   : > { %p968_p0 = por %p967_p13, %p966_p12 }
 0x126   : > { %p964_p11 = pneg %p963_p10 }
 0x128   : > { %p969_p1 = pnand %p968_p0, %p964_p11 }
 0x12a   : > { %972 = shalt.err (!%p969_p1)
}
 0x12b   : > { %862 = dma.vmem_to_hbm [thread:$0]  (%p1076_p5), %s666_s24, 32, %s663_s28, %s635_s29  }
 0x12c PF: > { %p872_p2 = scmp.ge.s32.totalorder %s1011_s15, 2  ;;  %s677_s11 = sand.u32 1, %s999_s12  }
 0x12d   : > { %s678_s17 = scalar_lea.sflag [#allocation3], %s677_s11 }
 0x12e   : > { %p866_p3 = pnand %p872_p2, %p1080_p6 }
 0x130   : > { %p867_p4 = pneg %p866_p3 }
 0x132   : > { %990 = dma.done.wait (%p867_p4), %s678_s17, 1024  }
 0x133   : > { %992 = vsyncadd (%p867_p4), %s678_s17, 4294966272  ;;  %s687_s19 = scalar_lea.sflag [#allocation5], %s677_s11 }
 0x134   : > { %994 = dma.done.wait (%p867_p4), %s687_s19, 32  }
 0x135   : > { %996 = vsyncadd (%p867_p4), %s687_s19, 4294967264  ;;  %p17_p5 = scmp.ge.s32.totalorder %s1063_s18, 4   ;;  %s1307_s12 = smov %s1003_s13 }
 0x136   : > { %s1308_s13 = smov %s1007_s14  ;;  %s1309_s14 = smov %s1074_s21 }
 0x137   : > { %s1310_s15 = smov %s1063_s18  ;;  %19 = sbr.rel (!%p17_p5) target bundleno = 5 (0x5), region = 80 }
 0x13c   :  { %692 = vsyncpa [#allocation3], 1 }
 0x13d   :  { %694 = vsyncpa [#allocation3 + $0x1], 1 }
 0x13e   :  { %695 = vsyncpa [#allocation5], 1 }
 0x13f   :  { %697 = vsyncpa [#allocation5 + $0x1], 1 }

</bundles_post_ra>
